<compile_context>
chip_gen: v5e
topology: v5e:2x2
jax: 0.10.0
libtpu: 0.0.40
codegen_flags: <defaults>
</compile_context>

<pallas_src>
import math

import jax
import jax.numpy as jnp
import numpy as np
from jax.experimental import pallas as pl
from jax.experimental.pallas import tpu as pltpu

# ----------------------------- model sizes ---------------------------------
B = 2          # batch
S = 8          # sequence length
D_MODEL = 32   # embedding size
H = 4          # attention heads
D_K = D_MODEL // H
NEG_INF = -1.0e9


# ------------------------------ Pallas kernel -------------------------------
def mha_kernel(q_ref, k_ref, v_ref, mask_ref,
               wqkv_ref, bqkv_ref, wo_ref, bo_ref,
               out_ref, attn_ref):
  # ---- projections on the flattened (B*S, D) slab (single MXU pass each) ----
  q_in = q_ref[...].reshape(B * S, D_MODEL)
  k_in = k_ref[...].reshape(B * S, D_MODEL)
  v_in = v_ref[...].reshape(B * S, D_MODEL)

  q = jnp.dot(q_in, wqkv_ref[0], preferred_element_type=jnp.float32) + bqkv_ref[0]
  k = jnp.dot(k_in, wqkv_ref[1], preferred_element_type=jnp.float32) + bqkv_ref[1]
  v = jnp.dot(v_in, wqkv_ref[2], preferred_element_type=jnp.float32) + bqkv_ref[2]

  # ---- head split: (B*S, D) -> (B*H, S, D_K), using only batched 2-D
  #      transposes of the minor dims plus tile-aligned reshapes ----
  def split_heads(x):
    x = jnp.swapaxes(x.reshape(B, S, D_MODEL), 1, 2)   # (B, D, S)
    x = x.reshape(B * H, D_K, S)                       # sublane-tile aligned split
    return jnp.swapaxes(x, 1, 2)                       # (B*H, S, D_K)

  qh = split_heads(q)
  kh = split_heads(k)
  vh = split_heads(v)

  # ---- scores for all heads at once (no explicit kh.T) ----
  scores = jnp.einsum("bqd,bkd->bqk", qh, kh,
                      preferred_element_type=jnp.float32)       # (B*H, S, S)
  scores = scores * (1.0 / math.sqrt(D_K))

  # mask (B,1,1,S), 1 = keep, 0 = mask  -> additive bias computed once
  mask_bias = jnp.where(mask_ref[...] == 0,
                        jnp.float32(NEG_INF), jnp.float32(0.0))  # (B,1,1,S)
  mask_bias = jnp.broadcast_to(mask_bias, (B, H, 1, S)).reshape(B * H, 1, S)
  scores = scores + mask_bias

  # ---- numerically-stable softmax over keys (batched over B*H) ----
  scores = scores - jnp.max(scores, axis=-1, keepdims=True)
  e = jnp.exp(scores)
  attn = e * pl.reciprocal(jnp.sum(e, axis=-1, keepdims=True), approx=True)

  # ---- context and head merge: (B*H, S, D_K) -> (B*S, D) ----
  ctx = jnp.einsum("bqk,bkd->bqd", attn, vh,
                   preferred_element_type=jnp.float32)           # (B*H, S, D_K)
  ctx = jnp.swapaxes(ctx, 1, 2).reshape(B, D_MODEL, S)           # (B, D, S)
  ctx = jnp.swapaxes(ctx, 1, 2).reshape(B * S, D_MODEL)          # (B*S, D)

  out = jnp.dot(ctx, wo_ref[...], preferred_element_type=jnp.float32) + bo_ref[...]

  out_ref[...] = out.reshape(B, S, D_MODEL)
  attn_ref[...] = attn.reshape(B, H, S, S)


# ------------------------------ wrapper -------------------------------------
def multi_head_attention(q, k, v, mask, params):
  """q,k,v: (B,S,D) f32; mask: (B,1,1,S) i32 (1=keep, 0=mask).

  Returns (output (B,S,D), attention_score (B,H,S,S)) like the PyTorch module.
  Single kernel invocation, no grid (problem fits one block / one TensorCore).
  """
  vmem = pl.BlockSpec(memory_space=pltpu.MemorySpace.VMEM)
  return pl.pallas_call(
      mha_kernel,
      out_shape=(jax.ShapeDtypeStruct((B, S, D_MODEL), jnp.float32),
                 jax.ShapeDtypeStruct((B, H, S, S), jnp.float32)),
      in_specs=[vmem] * 8,
      out_specs=(vmem, vmem),
  )(q, k, v, mask,
    params["w_qkv_t"], params["b_qkv"], params["wo_t"], params["bo"])


# ------------------------- pure-JAX reference --------------------------------
def mha_ref(q, k, v, mask, p):
  Q = (q @ p["w_qkv_t"][0] + p["b_qkv"][0]).reshape(B, S, H, D_K).transpose(0, 2, 1, 3)
  K = (k @ p["w_qkv_t"][1] + p["b_qkv"][1]).reshape(B, S, H, D_K).transpose(0, 2, 1, 3)
  V = (v @ p["w_qkv_t"][2] + p["b_qkv"][2]).reshape(B, S, H, D_K).transpose(0, 2, 1, 3)
  scores = jnp.einsum("bhqd,bhkd->bhqk", Q, K) / math.sqrt(D_K)
  scores = jnp.where(mask == 0, NEG_INF, scores)            # (B,1,1,S) broadcast
  attn = jax.nn.softmax(scores, axis=-1)
  ctx = jnp.einsum("bhqk,bhkd->bhqd", attn, V).transpose(0, 2, 1, 3).reshape(B, S, D_MODEL)
  return ctx @ p["wo_t"] + p["bo"], attn


# ------------------------------- main ----------------------------------------
def _linear_init(key, out_dim, in_dim):
  """PyTorch nn.Linear-style uniform init (deterministic via key)."""
  kw, kb = jax.random.split(key)
  bound = 1.0 / math.sqrt(in_dim)
  w = jax.random.uniform(kw, (out_dim, in_dim), jnp.float32, -bound, bound)
  b = jax.random.uniform(kb, (out_dim,), jnp.float32, -bound, bound)
  return w, b


if __name__ == "__main__":
  key = jax.random.PRNGKey(0)
  keys = jax.random.split(key, 8)

  wq, bq = _linear_init(keys[0], D_MODEL, D_MODEL)
  wk, bk = _linear_init(keys[1], D_MODEL, D_MODEL)
  wv, bv = _linear_init(keys[2], D_MODEL, D_MODEL)
  wo, bo = _linear_init(keys[3], D_MODEL, D_MODEL)

  # PyTorch Linear computes y = x @ W.T + b; pre-transpose and pack Q/K/V
  # weights/biases into single stacked tensors (fewer tiny parameter DMAs).
  params = {
      "w_qkv_t": jnp.stack([wq.T, wk.T, wv.T]),            # (3, D, D)
      "b_qkv": jnp.stack([bq, bk, bv])[:, None, :],        # (3, 1, D)
      "wo_t": wo.T,                                        # (D, D)
      "bo": bo.reshape(1, D_MODEL),                        # (1, D)
  }

  q_in = jax.random.normal(keys[4], (B, S, D_MODEL), dtype=jnp.float32)
  k_in = jax.random.normal(keys[5], (B, S, D_MODEL), dtype=jnp.float32)
  v_in = jax.random.normal(keys[6], (B, S, D_MODEL), dtype=jnp.float32)

  # key-padding mask: last 2 positions of batch element 1 are masked out
  mask_np = np.ones((B, 1, 1, S), dtype=np.int32)
  mask_np[1, 0, 0, -2:] = 0
  mask = jnp.asarray(mask_np)

  out, attn = multi_head_attention(q_in, k_in, v_in, mask, params)
  jax.block_until_ready((out, attn))

  ref_out, ref_attn = mha_ref(q_in, k_in, v_in, mask, params)
  assert out.shape == (B, S, D_MODEL) and attn.shape == (B, H, S, S)
  # tolerance loosened slightly because the softmax denominator uses the EUP
  # approximate reciprocal (per performance review)
  np.testing.assert_allclose(np.asarray(out), np.asarray(ref_out), rtol=2e-3, atol=2e-3)
  np.testing.assert_allclose(np.asarray(attn), np.asarray(ref_attn), rtol=2e-3, atol=2e-3)

  print("KERNEL_OK")
</pallas_src>

<mosaic_0001>
module attributes {stable_mosaic.version = 11 : i64} {
  func.func @mha_kernel(%arg0: memref<2x8x32xf32, #tpu.memory_space<vmem>>, %arg1: memref<2x8x32xf32, #tpu.memory_space<vmem>>, %arg2: memref<2x8x32xf32, #tpu.memory_space<vmem>>, %arg3: memref<2x1x1x8xi32, #tpu.memory_space<vmem>>, %arg4: memref<3x32x32xf32, #tpu.memory_space<vmem>>, %arg5: memref<3x1x32xf32, #tpu.memory_space<vmem>>, %arg6: memref<32x32xf32, #tpu.memory_space<vmem>>, %arg7: memref<1x32xf32, #tpu.memory_space<vmem>>, %arg8: memref<2x8x32xf32, #tpu.memory_space<vmem>>, %arg9: memref<2x4x8x8xf32, #tpu.memory_space<vmem>>) attributes {dimension_semantics = [], scalar_prefetch = 0 : i64, scratch_operands = 0 : i64, tpu.core_type = #tpu.core_type<tc>} {
    %c0 = arith.constant 0 : index
    %c0_0 = arith.constant 0 : index
    %c0_1 = arith.constant 0 : index
    %0 = vector.load %arg0[%c0, %c0_0, %c0_1] : memref<2x8x32xf32, #tpu.memory_space<vmem>>, vector<2x8x32xf32>
    %1 = vector.shape_cast %0 : vector<2x8x32xf32> to vector<16x32xf32>
    %c0_2 = arith.constant 0 : index
    %c0_3 = arith.constant 0 : index
    %c0_4 = arith.constant 0 : index
    %2 = vector.load %arg1[%c0_2, %c0_3, %c0_4] : memref<2x8x32xf32, #tpu.memory_space<vmem>>, vector<2x8x32xf32>
    %3 = vector.shape_cast %2 : vector<2x8x32xf32> to vector<16x32xf32>
    %c0_5 = arith.constant 0 : index
    %c0_6 = arith.constant 0 : index
    %c0_7 = arith.constant 0 : index
    %4 = vector.load %arg2[%c0_5, %c0_6, %c0_7] : memref<2x8x32xf32, #tpu.memory_space<vmem>>, vector<2x8x32xf32>
    %5 = vector.shape_cast %4 : vector<2x8x32xf32> to vector<16x32xf32>
    %c0_8 = arith.constant 0 : index
    %c0_9 = arith.constant 0 : index
    %c0_10 = arith.constant 0 : index
    %6 = vector.load %arg4[%c0_8, %c0_9, %c0_10] : memref<3x32x32xf32, #tpu.memory_space<vmem>>, vector<1x32x32xf32>
    %7 = vector.shape_cast %6 : vector<1x32x32xf32> to vector<32x32xf32>
    %cst = arith.constant dense<0.000000e+00> : vector<16x32xf32>
    %8 = tpu.matmul %1, %7, %cst {dimension_numbers = #tpu.dot_dimension_numbers<[1], [0], [0], [1], [0, 0, 1, 1], [], []>} : vector<16x32xf32>, vector<32x32xf32>, vector<16x32xf32> -> vector<16x32xf32>
    %c0_11 = arith.constant 0 : index
    %c0_12 = arith.constant 0 : index
    %c0_13 = arith.constant 0 : index
    %9 = vector.load %arg5[%c0_11, %c0_12, %c0_13] : memref<3x1x32xf32, #tpu.memory_space<vmem>>, vector<1x1x32xf32>
    %10 = vector.shape_cast %9 : vector<1x1x32xf32> to vector<1x32xf32>
    %11 = vector.broadcast %10 : vector<1x32xf32> to vector<16x32xf32>
    %12 = arith.addf %8, %11 : vector<16x32xf32>
    %c1 = arith.constant 1 : index
    %c0_14 = arith.constant 0 : index
    %c0_15 = arith.constant 0 : index
    %13 = vector.load %arg4[%c1, %c0_14, %c0_15] : memref<3x32x32xf32, #tpu.memory_space<vmem>>, vector<1x32x32xf32>
    %14 = vector.shape_cast %13 : vector<1x32x32xf32> to vector<32x32xf32>
    %cst_16 = arith.constant dense<0.000000e+00> : vector<16x32xf32>
    %15 = tpu.matmul %3, %14, %cst_16 {dimension_numbers = #tpu.dot_dimension_numbers<[1], [0], [0], [1], [0, 0, 1, 1], [], []>} : vector<16x32xf32>, vector<32x32xf32>, vector<16x32xf32> -> vector<16x32xf32>
    %c1_17 = arith.constant 1 : index
    %c0_18 = arith.constant 0 : index
    %c0_19 = arith.constant 0 : index
    %16 = vector.load %arg5[%c1_17, %c0_18, %c0_19] : memref<3x1x32xf32, #tpu.memory_space<vmem>>, vector<1x1x32xf32>
    %17 = vector.shape_cast %16 : vector<1x1x32xf32> to vector<1x32xf32>
    %18 = vector.broadcast %17 : vector<1x32xf32> to vector<16x32xf32>
    %19 = arith.addf %15, %18 : vector<16x32xf32>
    %c2 = arith.constant 2 : index
    %c0_20 = arith.constant 0 : index
    %c0_21 = arith.constant 0 : index
    %20 = vector.load %arg4[%c2, %c0_20, %c0_21] : memref<3x32x32xf32, #tpu.memory_space<vmem>>, vector<1x32x32xf32>
    %21 = vector.shape_cast %20 : vector<1x32x32xf32> to vector<32x32xf32>
    %cst_22 = arith.constant dense<0.000000e+00> : vector<16x32xf32>
    %22 = tpu.matmul %5, %21, %cst_22 {dimension_numbers = #tpu.dot_dimension_numbers<[1], [0], [0], [1], [0, 0, 1, 1], [], []>} : vector<16x32xf32>, vector<32x32xf32>, vector<16x32xf32> -> vector<16x32xf32>
    %c2_23 = arith.constant 2 : index
    %c0_24 = arith.constant 0 : index
    %c0_25 = arith.constant 0 : index
    %23 = vector.load %arg5[%c2_23, %c0_24, %c0_25] : memref<3x1x32xf32, #tpu.memory_space<vmem>>, vector<1x1x32xf32>
    %24 = vector.shape_cast %23 : vector<1x1x32xf32> to vector<1x32xf32>
    %25 = vector.broadcast %24 : vector<1x32xf32> to vector<16x32xf32>
    %26 = arith.addf %22, %25 : vector<16x32xf32>
    %27 = vector.shape_cast %12 : vector<16x32xf32> to vector<2x8x32xf32>
    %28 = tpu.transpose %27, [0, 2, 1] : vector<2x8x32xf32> -> vector<2x32x8xf32>
    %29 = vector.shape_cast %28 : vector<2x32x8xf32> to vector<8x8x8xf32>
    %30 = tpu.transpose %29, [0, 2, 1] : vector<8x8x8xf32> -> vector<8x8x8xf32>
    %31 = vector.shape_cast %19 : vector<16x32xf32> to vector<2x8x32xf32>
    %32 = tpu.transpose %31, [0, 2, 1] : vector<2x8x32xf32> -> vector<2x32x8xf32>
    %33 = vector.shape_cast %32 : vector<2x32x8xf32> to vector<8x8x8xf32>
    %34 = tpu.transpose %33, [0, 2, 1] : vector<8x8x8xf32> -> vector<8x8x8xf32>
    %35 = vector.shape_cast %26 : vector<16x32xf32> to vector<2x8x32xf32>
    %36 = tpu.transpose %35, [0, 2, 1] : vector<2x8x32xf32> -> vector<2x32x8xf32>
    %37 = vector.shape_cast %36 : vector<2x32x8xf32> to vector<8x8x8xf32>
    %38 = tpu.transpose %37, [0, 2, 1] : vector<8x8x8xf32> -> vector<8x8x8xf32>
    "tpu.trace_start"() <{level = 10 : i32, message = "bqd,bkd->bqk"}> : () -> ()
    %cst_26 = arith.constant dense<0.000000e+00> : vector<8x8x8xf32>
    %39 = tpu.matmul %30, %34, %cst_26 {dimension_numbers = #tpu.dot_dimension_numbers<[2], [2], [1], [1], [0, 0, 0, 1, 1, 1], [0], [0]>} : vector<8x8x8xf32>, vector<8x8x8xf32>, vector<8x8x8xf32> -> vector<8x8x8xf32>
    "tpu.trace_stop"() : () -> ()
    %cst_27 = arith.constant 0.353553385 : f32
    %40 = vector.broadcast %cst_27 : f32 to vector<8x8x8xf32>
    %41 = arith.mulf %39, %40 : vector<8x8x8xf32>
    %c0_28 = arith.constant 0 : index
    %c0_29 = arith.constant 0 : index
    %c0_30 = arith.constant 0 : index
    %c0_31 = arith.constant 0 : index
    %42 = vector.load %arg3[%c0_28, %c0_29, %c0_30, %c0_31] : memref<2x1x1x8xi32, #tpu.memory_space<vmem>>, vector<2x1x1x8xi32>
    %c0_i32 = arith.constant 0 : i32
    %43 = vector.broadcast %c0_i32 : i32 to vector<2x1x1x8xi32>
    %44 = arith.cmpi eq, %42, %43 : vector<2x1x1x8xi32>
    %cst_32 = arith.constant -1.000000e+09 : f32
    %cst_33 = arith.constant 0.000000e+00 : f32
    %45 = vector.broadcast %cst_32 : f32 to vector<2x1x1x8xf32>
    %46 = vector.broadcast %cst_33 : f32 to vector<2x1x1x8xf32>
    %47 = arith.select %44, %45, %46 : vector<2x1x1x8xi1>, vector<2x1x1x8xf32>
    %48 = vector.shape_cast %47 : vector<2x1x1x8xf32> to vector<2x1x1x8xf32>
    %49 = vector.broadcast %48 : vector<2x1x1x8xf32> to vector<2x4x1x8xf32>
    %50 = vector.shape_cast %49 : vector<2x4x1x8xf32> to vector<8x1x8xf32>
    %51 = vector.broadcast %50 : vector<8x1x8xf32> to vector<8x8x8xf32>
    %52 = arith.addf %41, %51 : vector<8x8x8xf32>
    %cst_34 = arith.constant dense<0xFF800000> : vector<8x8xf32>
    %53 = vector.multi_reduction <maximumf>, %52, %cst_34 [2] : vector<8x8x8xf32> to vector<8x8xf32>
    %54 = vector.shape_cast %53 : vector<8x8xf32> to vector<8x8x1xf32>
    %55 = vector.broadcast %54 : vector<8x8x1xf32> to vector<8x8x8xf32>
    %56 = arith.subf %52, %55 : vector<8x8x8xf32>
    %57 = math.exp %56 : vector<8x8x8xf32>
    %cst_35 = arith.constant dense<0.000000e+00> : vector<8x8xf32>
    %58 = vector.multi_reduction <add>, %57, %cst_35 [2] : vector<8x8x8xf32> to vector<8x8xf32>
    %59 = vector.shape_cast %58 : vector<8x8xf32> to vector<8x8x1xf32>
    %60 = tpu.reciprocal %59 {approx = true} : vector<8x8x1xf32> -> vector<8x8x1xf32>
    %61 = vector.broadcast %60 : vector<8x8x1xf32> to vector<8x8x8xf32>
    %62 = arith.mulf %57, %61 : vector<8x8x8xf32>
    "tpu.trace_start"() <{level = 10 : i32, message = "bqk,bkd->bqd"}> : () -> ()
    %cst_36 = arith.constant dense<0.000000e+00> : vector<8x8x8xf32>
    %63 = tpu.matmul %62, %38, %cst_36 {dimension_numbers = #tpu.dot_dimension_numbers<[2], [1], [1], [2], [0, 0, 0, 1, 1, 2], [0], [0]>} : vector<8x8x8xf32>, vector<8x8x8xf32>, vector<8x8x8xf32> -> vector<8x8x8xf32>
    "tpu.trace_stop"() : () -> ()
    %64 = tpu.transpose %63, [0, 2, 1] : vector<8x8x8xf32> -> vector<8x8x8xf32>
    %65 = vector.shape_cast %64 : vector<8x8x8xf32> to vector<2x32x8xf32>
    %66 = tpu.transpose %65, [0, 2, 1] : vector<2x32x8xf32> -> vector<2x8x32xf32>
    %67 = vector.shape_cast %66 : vector<2x8x32xf32> to vector<16x32xf32>
    %c0_37 = arith.constant 0 : index
    %c0_38 = arith.constant 0 : index
    %68 = vector.load %arg6[%c0_37, %c0_38] : memref<32x32xf32, #tpu.memory_space<vmem>>, vector<32x32xf32>
    %cst_39 = arith.constant dense<0.000000e+00> : vector<16x32xf32>
    %69 = tpu.matmul %67, %68, %cst_39 {dimension_numbers = #tpu.dot_dimension_numbers<[1], [0], [0], [1], [0, 0, 1, 1], [], []>} : vector<16x32xf32>, vector<32x32xf32>, vector<16x32xf32> -> vector<16x32xf32>
    %c0_40 = arith.constant 0 : index
    %c0_41 = arith.constant 0 : index
    %70 = vector.load %arg7[%c0_40, %c0_41] : memref<1x32xf32, #tpu.memory_space<vmem>>, vector<1x32xf32>
    %71 = vector.broadcast %70 : vector<1x32xf32> to vector<16x32xf32>
    %72 = arith.addf %69, %71 : vector<16x32xf32>
    %73 = vector.shape_cast %72 : vector<16x32xf32> to vector<2x8x32xf32>
    %c0_42 = arith.constant 0 : index
    %c0_43 = arith.constant 0 : index
    %c0_44 = arith.constant 0 : index
    %74 = vector.load %arg8[%c0_42, %c0_43, %c0_44] : memref<2x8x32xf32, #tpu.memory_space<vmem>>, vector<2x8x32xf32>
    tpu.vector_store %arg8[%c0_42, %c0_43, %c0_44], %73 {strides = array<i32>} : memref<2x8x32xf32, #tpu.memory_space<vmem>>, vector<2x8x32xf32>,
    %75 = vector.shape_cast %62 : vector<8x8x8xf32> to vector<2x4x8x8xf32>
    %c0_45 = arith.constant 0 : index
    %c0_46 = arith.constant 0 : index
    %c0_47 = arith.constant 0 : index
    %c0_48 = arith.constant 0 : index
    %76 = vector.load %arg9[%c0_45, %c0_46, %c0_47, %c0_48] : memref<2x4x8x8xf32, #tpu.memory_space<vmem>>, vector<2x4x8x8xf32>
    tpu.vector_store %arg9[%c0_45, %c0_46, %c0_47, %c0_48], %75 {strides = array<i32>} : memref<2x4x8x8xf32, #tpu.memory_space<vmem>>, vector<2x4x8x8xf32>,
    return
  }
}

</mosaic_0001>

<bundles_post_ra>
// kernel: tpu_custom_call.1
= control target key start
LH: loop header
LB: loop body
LE: loop exit
PB: predicated region body
PF: predicated region fallthrough
CT: control target
= control target key end

     0   :  { %15 = vsyncpa [#allocation3], 0  ;;  %s2098_s0 = inlined_call_operand.hbm [shape: f32[2,8,32], index: 0, kind: input, shape index: {}]   ;;  %s2099_s1 = inlined_call_operand.hbm [shape: f32[2,8,32], index: 1, kind: input, shape index: {}]   ;;  %s2100_s2 = inlined_call_operand.hbm [shape: f32[2,8,32], index: 2, kind: input, shape index: {}]   ;;  %s2101_s3 = inlined_call_operand.hbm [shape: s32[2,1,1,8], index: 3, kind: input, shape index: {}]   ;;  %s2102_s4 = inlined_call_operand.hbm [shape: f32[3,32,32], index: 4, kind: input, shape index: {}]   ;;  %s2103_s5 = inlined_call_operand.vmem [shape: f32[3,1,32], index: 5, kind: input, shape index: {}]   ;;  %s2104_s6 = inlined_call_operand.hbm [shape: f32[32,32], index: 6, kind: input, shape index: {}]   ;;  %s2105_s7 = inlined_call_operand.vmem [shape: f32[1,32], index: 7, kind: input, shape index: {}]   ;;  %s2106_s8 = inlined_call_operand.hbm [shape: f32[2,8,32], index: 8, kind: output, shape index: {0}]   ;;  %s2107_s9 = inlined_call_operand.hbm [shape: f32[2,4,8,8], index: 9, kind: output, shape index: {1}]  }
   0x1   :  { %16 = vsyncpa [#allocation6], 0 }
   0x2   :  { %17 = vsyncpa [#allocation9], 0 }
   0x3   :  { %18 = vsyncpa [#allocation12], 0 }
   0x4   :  { %19 = vsyncpa [#allocation4], 0 }
   0x5   :  { %20 = vsyncpa [#allocation15], 0  ;;  %s38_s11 = sshll.u32 %s2099_s1, 4  ;;  %s1904_s12 = smov [#allocation5]   ;;  %s39_s11 = int_to_ptr.hbm [resolvable:$true] %s38_s11 }
   0x6   :  { %s40_s13 = sshll.u32 %s1904_s12, 4  ;;  %s64_s16 = sshll.u32 %s2101_s3, 4  ;;  %s41_s13 = int_to_ptr.vmem [resolvable:$true] %s40_s13  ;;  %s65_s16 = int_to_ptr.hbm [resolvable:$true] %s64_s16 }
   0x7   :  { %s1905_s17 = smov 128   ;;  %s1906_s18 = smov 8  }
   0x8   :  { %46 = dma.hbm_to_vmem [thread:$0]  %s39_s11, 256, %s41_s13, [#allocation6], %s1905_s17, %s1905_s17, %s1906_s18  }
   0x9   :  { %s1907_s19 = smov [#allocation8]   ;;  %s1908_s21 = smov 16  }
   0xa   :  { %s66_s20 = sshll.u32 %s1907_s19, 4  ;;  %s1909_s1 = smov 1   ;;  %s67_s20 = int_to_ptr.vmem [resolvable:$true] %s66_s20 }
   0xb   :  { %72 = dma.hbm_to_vmem [thread:$0]  %s65_s16, 32, %s67_s20, [#allocation9], %s1908_s21, %s1908_s21, %s1909_s1  }
   0xc   :  { %s25_s24 = sshll.u32 %s2098_s0, 4  ;;  %s1910_s25 = smov [#allocation2]   ;;  %s26_s24 = int_to_ptr.hbm [resolvable:$true] %s25_s24 }
   0xd   :  { %s27_s3 = sshll.u32 %s1910_s25, 4  ;;  %s51_s28 = sshll.u32 %s2100_s2, 4  ;;  %s28_s3 = int_to_ptr.vmem [resolvable:$true] %s27_s3  ;;  %s52_s28 = int_to_ptr.hbm [resolvable:$true] %s51_s28 }
   0xe   :  { %33 = dma.hbm_to_vmem [thread:$0]  %s26_s24, 256, %s28_s3, [#allocation3], %s1905_s17, %s1905_s17, %s1906_s18  }
   0xf   :  { %s1911_s29 = smov [#allocation7]   ;;  %s77_s12 = sshll.u32 %s2102_s4, 4  ;;  %s78_s12 = int_to_ptr.hbm [resolvable:$true] %s77_s12 }
  0x10   :  { %s53_s30 = sshll.u32 %s1911_s29, 4  ;;  %s92_s2 = sshll.u32 %s2104_s6, 4  ;;  %s54_s30 = int_to_ptr.vmem [resolvable:$true] %s53_s30  ;;  %s93_s2 = int_to_ptr.hbm [resolvable:$true] %s92_s2 }
  0x11   :  { %59 = dma.hbm_to_vmem [thread:$0]  %s52_s28, 256, %s54_s30, [#allocation6], %s1905_s17, %s1905_s17, %s1906_s18  }
  0x12   :  { %s1912_s14 = smov [#allocation10]   ;;  %s1913_s16 = smov [#allocation11]  }
  0x13   :  { %s79_s15 = sshll.u32 %s1912_s14, 4  ;;  %s94_s4 = sshll.u32 %s1913_s16, 4  ;;  %s80_s15 = int_to_ptr.vmem [resolvable:$true] %s79_s15  ;;  %s95_s4 = int_to_ptr.vmem [resolvable:$true] %s94_s4 }
  0x14   :  { %85 = dma.hbm_to_vmem [thread:$0]  %s78_s12, 1536, %s80_s15, [#allocation9], %s1905_s17, %s1905_s17, %s1906_s18  }
  0x15   :  { %100 = dma.hbm_to_vmem [thread:$0]  %s93_s2, 512, %s95_s4, [#allocation12], %s1905_s17, %s1905_s17, %s1906_s18  }
  0x16   :  { %1892 = dma.done.wait [#allocation3], 256  }
  0x17   :  { %1893 = vsyncadd [#allocation3], 4294967040 }
  0x18   :  { %1894 = dma.done.wait [#allocation6], 512  }
  0x19   :  { %1895 = vsyncadd [#allocation6], 4294966784 }
  0x1a   :  { %1896 = dma.done.wait [#allocation9], 1568  }
  0x1b   :  { %1897 = vsyncadd [#allocation9], 4294965728 }
  0x1c   :  { %1898 = dma.done.wait [#allocation12], 512  }
  0x1d   :  { %1899 = vsyncadd [#allocation12], 4294966784  ;;  %v136_v0 = vld [vmem:[#allocation10 + $0x18] sm:$0xff]  ;;  %v135_v1 = vld [vmem:[#allocation10 + $0x10] sm:$0xff]  ;;  %vm141_vm0 = vcmask 261120   ;;  %vm697_vm1 = vcmask 64512  }
  0x1e   :  { %160 = vmatpush.msra.mxu0 %v136_v0  ;;  %v134_v2 = vld [vmem:[#allocation10 + $0x8] sm:$0xff]  ;;  %v133_v3 = vld [vmem:[#allocation10] sm:$0xff]  ;;  %v175_v5 = vld [vmem:[#allocation10 + $0x38] sm:$0xff]  ;;  %v1914_v46 = vmov 0.0   ;;  %s1592_s3 = sshll.u32 %s2107_s9, 4  ;;  %s1916_s28 = smov [#allocation13]   ;;  %s1593_s3 = int_to_ptr.hbm [resolvable:$true] %s1592_s3 }
  0x1f   :  { %v127_v4 = vld [vmem:[#allocation2] sm:$0xff]  ;;  %199 = vmatpush.msra.mxu1 %v175_v5  ;;  %v128_v7 = vld [vmem:[#allocation2 + $0x8] sm:$0xff]  ;;  %1647 = vmatpush.msra.mxu2 %v175_v5  ;;  %v172_v9 = vld [vmem:[#allocation10 + $0x20] sm:$0xff]  ;;  %s1577_s29 = sshll.u32 %s1916_s28, 4  ;;  %s1579_s9 = sshll.u32 %s2106_s8, 4  ;;  %s1578_s29 = int_to_ptr.vmem [resolvable:$true] %s1577_s29  ;;  %s1580_s9 = int_to_ptr.hbm [resolvable:$true] %s1579_s9 }
  0x20   :  { %161 = vmatpush.msra.mxu0 %v135_v1  ;;  %v174_v6 = vld [vmem:[#allocation10 + $0x30] sm:$0xff]  ;;  %v173_v8 = vld [vmem:[#allocation10 + $0x28] sm:$0xff]  ;;  %v129_v10 = vld [vmem:[#allocation5] sm:$0xff] }
  0x21   :  { %200 = vmatpush.msra.mxu1 %v174_v6  ;;  %1648 = vmatpush.msra.mxu2 %v174_v6  ;;  %v1664_v11 = vld [vmem:[%s2103_s5] ss:$0 sm:$0xff]  ;;  %v1665_v14 = vld [vmem:[%s2103_s5 + $0x1] ss:$0 sm:$0xff]  ;;  %v130_v17 = vld [vmem:[#allocation5 + $0x8] sm:$0xff] }
  0x22   :  { %162 = vmatpush.msra.mxu0 %v134_v2  ;;  %v214_v36 = vld [vmem:[#allocation10 + $0x58] sm:$0xff]  ;;  %v213_v37 = vld [vmem:[#allocation10 + $0x50] sm:$0xff]  ;;  %v212_v38 = vld [vmem:[#allocation10 + $0x48] sm:$0xff] }
  0x23   :  { %201 = vmatpush.msra.mxu1 %v173_v8  ;;  %1649 = vmatpush.msra.mxu2 %v173_v8  ;;  %v211_v39 = vld [vmem:[#allocation10 + $0x40] sm:$0xff]  ;;  %v131_v40 = vld [vmem:[#allocation7] sm:$0xff]  ;;  %v132_v42 = vld [vmem:[#allocation7 + $0x8] sm:$0xff] }
  0x24   :  { %163 = vmatpush.msra.mxu0 %v133_v3  ;;  %v890_v45 = vld [vmem:[#allocation8] sm:$0x1] }
  0x25   :  { %1613 = vmatmul.msk.f32.vlgmr.msra.gmra.mxu0 %vm141_vm0, %v127_v4  ;;  %202 = vmatpush.msra.mxu1 %v172_v9  ;;  %vm892_vm2 = vcmp.eq.s32.totalorder %v890_v45, 0 }
  0x26   :  { %1650 = vmatpush.msra.mxu2 %v172_v9  ;;  %1616 = vmatmul.msk.f32.vlgmr.msra.gmra.mxu1 %vm141_vm0, %v129_v10  ;;  %v894_v47 = vsel %vm892_vm2, -1e+09, %v1914_v46 }
  0x27   :  { %1617 = vmatmul.msk.f32.vlgmr.msra.gmra.mxu2 %vm141_vm0, %v130_v17  ;;  %v2015_v50 = vperm.slane %v894_v47, 0 }
  0x28   :  { %238 = vmatpush.msrb.mxu2 %v214_v36 }
  0x2a   :  { %239 = vmatpush.msrb.mxu2 %v213_v37 }
  0x2c   :  { %240 = vmatpush.msrb.mxu2 %v212_v38 }
  0x2d   :  { %1614 = vmatmul.msk.f32.gmra.mxu0 %vm141_vm0, %v128_v7 }
  0x2e   :  { %241 = vmatpush.msrb.mxu2 %v211_v39 }
  0x2f   :  { %1619 = vmatmul.msk.f32.vlgmr.msrb.gmra.mxu2 %vm141_vm0, %v131_v40 }
  0x37   :  { %1620 = vmatmul.msk.f32.gmra.mxu2 %vm141_vm0, %v132_v42 }
  0xa2   :  { %v165_v12 = vpop.f32.mrf.mxu0 }
  0xa3   :  { %v166_v13 = vadd.f32 %v1664_v11, %v165_v12  ;;  %v204_v15 = vpop.f32.mrf.mxu1 }
  0xa4   :  { %v205_v16 = vadd.f32 %v1665_v14, %v204_v15 }
  0xa5   :  { %249 = vxpose.xlu0.b32.start.end [1/1] (short) (narrow) %v166_v13, 32 }
  0xaa   :  { %v168_v19 = vpop.f32.mrf.mxu0  ;;  %v207_v25 = vpop.f32.mrf.mxu2 }
  0xab   :  { %v169_v20 = vadd.f32 %v1664_v11, %v168_v19  ;;  %v208_v26 = vadd.f32 %v1665_v14, %v207_v25  ;;  %v891_v11 = vld [vmem:[#allocation8 + $0x1] sm:$0x1] }
  0xac   :  { %vm893_vm3 = vcmp.eq.s32.totalorder %v891_v11, 0 }
  0xad   :  { %v895_v12 = vsel %vm893_vm3, -1e+09, %v1914_v46 }
  0xae   :  { %v899_v13 = vperm.slane %v895_v12, 0 }
  0xb2   :  { %v2029_v9 = vpop.f32.mrf.mxu2 }
  0xba   :  { %v2031_v10 = vpop.f32.mrf.mxu2 }
  0xc5   :  { %569 = vxpose.xlu0.b32.start.end [1/1] (short) (narrow) %v205_v16, 32 }
 0x149   :  { %v265_v18 = vpop.trf.xlu0 }
 0x14a   :  { %313 = vxpose.xlu1.b32.start.end [1/1] (short) (narrow) %v265_v18, 8 }
 0x151   :  { %v266_v21 = vpop.trf.xlu0 }
 0x152   :  { %281 = vxpose.xlu1.b32.start.end [1/1] (short) (narrow) %v169_v20, 32  ;;  %345 = vxpose.xlu2.b32.start.end [1/1] (short) (narrow) %v266_v21, 8 }
 0x159   :  { %v267_v22 = vpop.trf.xlu0 }
 0x15a   :  { %377 = vxpose.xlu2.b32.start.end [1/1] (short) (narrow) %v267_v22, 8 }
 0x161   :  { %v268_v23 = vpop.trf.xlu0 }
 0x162   :  { %409 = vxpose.xlu0.b32.start.end [1/1] (short) (narrow) %v268_v23, 8 }
 0x169   :  { %v585_v24 = vpop.trf.xlu0 }
 0x16a   :  { %716 = vmatpush.msra.mxu3 %v585_v24 }
 0x171   :  { %v586_v28 = vpop.trf.xlu0 }
 0x172   :  { %601 = vxpose.xlu1.b32.start.end [1/1] (short) (narrow) %v208_v26, 32  ;;  %739 = vmatpush.msrb.mxu3 %v586_v28 }
 0x179   :  { %v587_v31 = vpop.trf.xlu0 }
 0x181   :  { %v588_v55 = vpop.trf.xlu0 }
 0x182   :  { %785 = vmatpush.msrb.mxu0 %v588_v55 }
 0x1eb   :  { %v361_v29 = vpop.trf.xlu2 }
 0x1ee   :  { %v329_v27 = vpop.trf.xlu1 }
 0x1ef   :  { %1621 = vmatmul.msk.f32.vlgmr.msra.gmra.mxu3 %vm697_vm1, %v329_v27 }
 0x1f0   :  { %762 = vmatpush.msra.mxu3 %v587_v31 }
 0x1f3   :  { %v393_v32 = vpop.trf.xlu2 }
 0x1f6   :  { %v297_v30 = vpop.trf.xlu1 }
 0x1f7   :  { %1622 = vmatmul.msk.f32.vlgmr.msrb.gmra.mxu3 %vm697_vm1, %v361_v29 }
 0x1fe   :  { %v298_v33 = vpop.trf.xlu1 }
 0x1ff   :  { %473 = vxpose.xlu2.b32.start.end [1/1] (short) (narrow) %v298_v33, 8  ;;  %1623 = vmatmul.msk.f32.vlgmr.msra.gmra.mxu3 %vm697_vm1, %v393_v32 }
 0x206   :  { %v299_v34 = vpop.trf.xlu1  ;;  %v425_v62 = vpop.trf.xlu0 }
 0x207   :  { %505 = vxpose.xlu2.b32.start.end [1/1] (short) (narrow) %v299_v34, 8  ;;  %1624 = vmatmul.msk.f32.vlgmr.msrb.gmra.mxu0 %vm697_vm1, %v425_v62 }
 0x20e   :  { %v300_v35 = vpop.trf.xlu1 }
 0x20f   :  { %441 = vxpose.xlu2.b32.start.end [1/1] (short) (narrow) %v297_v30, 8 }
 0x216   :  { %v617_v41 = vpop.trf.xlu1 }
 0x217   :  { %537 = vxpose.xlu2.b32.start.end [1/1] (short) (narrow) %v300_v35, 8  ;;  %808 = vmatpush.msrb.mxu1 %v617_v41 }
 0x21e   :  { %v618_v43 = vpop.trf.xlu1 }
 0x21f   :  { %831 = vmatpush.msra.mxu2 %v618_v43 }
 0x226   :  { %v619_v48 = vpop.trf.xlu1 }
 0x227   :  { %854 = vmatpush.msrb.mxu3 %v619_v48 }
 0x22e   :  { %v620_v63 = vpop.trf.xlu1 }
 0x22f   :  { %877 = vmatpush.msra.mxu0 %v620_v63 }
 0x272   :  { %v718_v44 = vpop.f32.mrf.mxu3 }
 0x273   :  { %v882_v53 = vmul.f32 0.35355338, %v718_v44 }
 0x275   :  { %v902_v57 = vadd.f32 %v2015_v50, %v882_v53 }
 0x277   :  { %v910_v60 = vsel %vm697_vm1, %v902_v57, -inf }
 0x27a   :  { %v741_v49 = vpop.f32.mrf.mxu3 }
 0x27b   :  { %v883_v51 = vmul.f32 0.35355338, %v741_v49 }
 0x27d   :  { %v903_v52 = vadd.f32 %v2015_v50, %v883_v51 }
 0x27f   :  { %v913_v54 = vsel %vm697_vm1, %v903_v52, -inf }
 0x280   :  { %914 = vmax.xlane.f32.xlu1 %v913_v54 }
 0x282   :  { %v764_v56 = vpop.f32.mrf.mxu3 }
 0x283   :  { %v884_v58 = vmul.f32 0.35355338, %v764_v56 }
 0x284   :  { %v787_v19 = vpop.f32.mrf.mxu0 }
 0x285   :  { %v904_v59 = vadd.f32 %v2015_v50, %v884_v58  ;;  %v885_v27 = vmul.f32 0.35355338, %v787_v19 }
 0x287   :  { %v916_v61 = vsel %vm697_vm1, %v904_v59, -inf  ;;  %v905_v33 = vadd.f32 %v2015_v50, %v885_v27 }
 0x288   :  { %911 = vmax.xlane.f32.xlu2 %v910_v60  ;;  %917 = vmax.xlane.f32.xlu0 %v916_v61 }
 0x289   :  { %v919_v37 = vsel %vm697_vm1, %v905_v33, -inf }
 0x298   :  { %v489_v0 = vpop.trf.xlu2 }
 0x299   :  { %1626 = vmatmul.msk.f32.vlgmr.msra.gmra.mxu2 %vm697_vm1, %v489_v0 }
 0x2a0   :  { %v521_v1 = vpop.trf.xlu2 }
 0x2a1   :  { %1627 = vmatmul.msk.f32.vlgmr.msrb.gmra.mxu3 %vm697_vm1, %v521_v1 }
 0x2a8   :  { %v457_v2 = vpop.trf.xlu2 }
 0x2a9   :  { %1625 = vmatmul.msk.f32.vlgmr.msrb.gmra.mxu1 %vm697_vm1, %v457_v2 }
 0x2b0   :  { %v553_v3 = vpop.trf.xlu2 }
 0x2b1   :  { %1628 = vmatmul.msk.f32.vlgmr.msra.gmra.mxu0 %vm697_vm1, %v553_v3 }
 0x2f3   :  { %v915_v21 = vpop.xlane.xlu1 %914 }
 0x2f4   :  { %v935_v26 = vsub.f32 %v903_v52, %v915_v21 }
 0x2f6   :  { %v944_v32 = vmul.f32 1.442695, %v935_v26 }
 0x2fb   :  { %v912_v4 = vpop.xlane.xlu2 %911  ;;  %v918_v23 = vpop.xlane.xlu0 %917 }
 0x2fc   :  { %v934_v5 = vsub.f32 %v902_v57, %v912_v4  ;;  %v936_v30 = vsub.f32 %v904_v59, %v918_v23 }
 0x2fe   :  { %v942_v6 = vmul.f32 1.442695, %v934_v5  ;;  %v946_v34 = vmul.f32 1.442695, %v936_v30 }
 0x300   :  { %1668 = vpow2.f32 %v942_v6 }
 0x301   :  { %1670 = vpow2.f32 %v944_v32 }
 0x302   :  { %1672 = vpow2.f32 %v946_v34 }
 0x306   :  { %v1669_v7 = vpop.eup %1668 }
 0x307   :  { %v958_v8 = vsel %vm697_vm1, %v1669_v7, 0.0  ;;  %v1671_v40 = vpop.eup %1670 }
 0x308   :  { %959 = vadd.xlane.f32.xlu0 %v958_v8  ;;  %v1673_v41 = vpop.eup %1672  ;;  %v961_v42 = vsel %vm697_vm1, %v1671_v40, 0.0 }
 0x309   :  { %v964_v43 = vsel %vm697_vm1, %v1673_v41, 0.0 }
 0x31c   :  { %v833_v14 = vpop.f32.mrf.mxu2 }
 0x31d   :  { %v887_v15 = vmul.f32 0.35355338, %v833_v14 }
 0x31f   :  { %v907_v16 = vadd.f32 %v899_v13, %v887_v15 }
 0x321   :  { %v925_v17 = vsel %vm697_vm1, %v907_v16, -inf }
 0x322   :  { %926 = vmax.xlane.f32.xlu2 %v925_v17 }
 0x324   :  { %v856_v18 = vpop.f32.mrf.mxu3 }
 0x325   :  { %v888_v20 = vmul.f32 0.35355338, %v856_v18 }
 0x326   :  { %v810_v22 = vpop.f32.mrf.mxu1 }
 0x327   :  { %v886_v24 = vmul.f32 0.35355338, %v810_v22  ;;  %v908_v25 = vadd.f32 %v899_v13, %v888_v20 }
 0x329   :  { %v928_v28 = vsel %vm697_vm1, %v908_v25, -inf  ;;  %v906_v29 = vadd.f32 %v899_v13, %v886_v24 }
 0x32a   :  { %929 = vmax.xlane.f32.xlu2 %v928_v28 }
 0x32b   :  { %v922_v31 = vsel %vm697_vm1, %v906_v29, -inf }
 0x32c   :  { %923 = vmax.xlane.f32.xlu1 %v922_v31 }
 0x32e   :  { %v879_v35 = vpop.f32.mrf.mxu0 }
 0x32f   :  { %v889_v36 = vmul.f32 0.35355338, %v879_v35 }
 0x331   :  { %v909_v38 = vadd.f32 %v899_v13, %v889_v36 }
 0x333   :  { %v931_v39 = vsel %vm697_vm1, %v909_v38, -inf }
 0x334   :  { %920 = vmax.xlane.f32.xlu1 %v919_v37  ;;  %932 = vmax.xlane.f32.xlu2 %v931_v39 }
 0x33c   :  { %962 = vadd.xlane.f32.xlu1 %v961_v42  ;;  %965 = vadd.xlane.f32.xlu2 %v964_v43 }
 0x37b   :  { %v960_v44 = vpop.xlane.xlu0 %959 }
 0x37c   :  { %1674 = vrcp.f32 %v960_v44 }
 0x382   :  { %v1675_v45 = vpop.eup %1674 }
 0x383   :  { %v2041_v46 = vmul.f32 %v1675_v45, %v1669_v7 }
 0x385   :  { %1565 = vst.msk [vmem:[#allocation14] sm:$0xff] %vm697_vm1, %v2041_v46 }
 0x395   :  { %v927_v47 = vpop.xlane.xlu2 %926 }
 0x396   :  { %v939_v48 = vsub.f32 %v907_v16, %v927_v47  ;;  %v1666_v16 = vld [vmem:[%s2103_s5 + $0x2] ss:$0 sm:$0xff]  ;;  %s1915_s5 = smov [#allocation14]  }
 0x397   :  { %v244_v17 = vadd.f32 %v1666_v16, %v2029_v9  ;;  %v247_v18 = vadd.f32 %v1666_v16, %v2031_v10  ;;  %s1590_s23 = sshll.u32 %s1915_s5, 4  ;;  %s1591_s23 = int_to_ptr.vmem [resolvable:$true] %s1590_s23 }
 0x398   :  { %v952_v49 = vmul.f32 1.442695, %v939_v48 }
 0x39a   :  { %1676 = vpow2.f32 %v952_v49 }
 0x39d   :  { %v930_v50 = vpop.xlane.xlu2 %929 }
 0x39e   :  { %v940_v51 = vsub.f32 %v908_v25, %v930_v50 }
 0x39f   :  { %v924_v52 = vpop.xlane.xlu1 %923 }
 0x3a0   :  { %v1677_v53 = vpop.eup %1676  ;;  %v954_v54 = vmul.f32 1.442695, %v940_v51  ;;  %v938_v55 = vsub.f32 %v906_v29, %v924_v52  ;;  %v1529_v51 = vld [vmem:[#allocation11 + $0x18] sm:$0xff]  ;;  %v1528_v52 = vld [vmem:[#allocation11 + $0x10] sm:$0xff] }
 0x3a1   :  { %v973_v56 = vsel %vm697_vm1, %v1677_v53, 0.0 }
 0x3a2   :  { %1678 = vpow2.f32 %v954_v54  ;;  %v950_v57 = vmul.f32 1.442695, %v938_v55  ;;  %974 = vadd.xlane.f32.xlu1 %v973_v56  ;;  %v1526_v54 = vld [vmem:[#allocation11] sm:$0xff] }
 0x3a4   :  { %1680 = vpow2.f32 %v950_v57 }
 0x3a7   :  { %v921_v58 = vpop.xlane.xlu1 %920  ;;  %v933_v59 = vpop.xlane.xlu2 %932 }
 0x3a8   :  { %v1679_v60 = vpop.eup %1678  ;;  %v937_v61 = vsub.f32 %v905_v33, %v921_v58  ;;  %v941_v62 = vsub.f32 %v909_v38, %v933_v59 }
 0x3a9   :  { %v976_v63 = vsel %vm697_vm1, %v1679_v60, 0.0 }
 0x3aa   :  { %v1681_v0 = vpop.eup %1680  ;;  %v948_v1 = vmul.f32 1.442695, %v937_v61  ;;  %v956_v2 = vmul.f32 1.442695, %v941_v62  ;;  %977 = vadd.xlane.f32.xlu2 %v976_v63  ;;  %v1667_v62 = vld [vmem:[%s2105_s7] ss:$0 sm:$0xff] }
 0x3ab   :  { %v970_v3 = vsel %vm697_vm1, %v1681_v0, 0.0 }
 0x3ac   :  { %1682 = vpow2.f32 %v948_v1  ;;  %971 = vadd.xlane.f32.xlu0 %v970_v3 }
 0x3ad   :  { %1684 = vpow2.f32 %v956_v2 }
 0x3af   :  { %v963_v4 = vpop.xlane.xlu1 %962  ;;  %v966_v5 = vpop.xlane.xlu2 %965 }
 0x3b0   :  { %1686 = vrcp.f32 %v963_v4 }
 0x3b1   :  { %1688 = vrcp.f32 %v966_v5 }
 0x3b2   :  { %v1683_v6 = vpop.eup %1682 }
 0x3b3   :  { %v1685_v7 = vpop.eup %1684  ;;  %v967_v8 = vsel %vm697_vm1, %v1683_v6, 0.0 }
 0x3b4   :  { %968 = vadd.xlane.f32.xlu1 %v967_v8  ;;  %v979_v11 = vsel %vm697_vm1, %v1685_v7, 0.0 }
 0x3b5   :  { %980 = vadd.xlane.f32.xlu0 %v979_v11 }
 0x3b6   :  { %v1687_v12 = vpop.eup %1686 }
 0x3b7   :  { %v1689_v13 = vpop.eup %1688  ;;  %v991_v14 = vmul.f32 %v1687_v12, %v1671_v40 }
 0x3b8   :  { %v992_v15 = vmul.f32 %v1689_v13, %v1673_v41 }
 0x3b9   :  { %1566 = vst.msk [vmem:[#allocation14 + $0x8] sm:$0xff] %vm697_vm1, %v991_v14 }
 0x3ba   :  { %1567 = vst.msk [vmem:[#allocation14 + $0x10] sm:$0xff] %vm697_vm1, %v992_v15 }
 0x3d3   :  { %633 = vxpose.xlu2.b32.start.end [1/1] (short) (narrow) %v244_v17, 32 }
 0x3ee   :  { %665 = vxpose.xlu1.b32.start.end [1/1] (short) (narrow) %v247_v18, 32 }
 0x415   :  { %v975_v19 = vpop.xlane.xlu1 %974 }
 0x416   :  { %1690 = vrcp.f32 %v975_v19 }
 0x41c   :  { %v1691_v20 = vpop.eup %1690 }
 0x41d   :  { %v995_v21 = vmul.f32 %v1691_v20, %v1677_v53  ;;  %v978_v22 = vpop.xlane.xlu2 %977  ;;  %v1527_v53 = vld [vmem:[#allocation11 + $0x8] sm:$0xff] }
 0x41e   :  { %1692 = vrcp.f32 %v978_v22 }
 0x41f   :  { %1570 = vst.msk [vmem:[#allocation14 + $0x28] sm:$0xff] %vm697_vm1, %v995_v21  ;;  %v972_v23 = vpop.xlane.xlu0 %971 }
 0x420   :  { %1694 = vrcp.f32 %v972_v23 }
 0x424   :  { %v1693_v24 = vpop.eup %1692 }
 0x425   :  { %v996_v25 = vmul.f32 %v1693_v24, %v1679_v60 }
 0x426   :  { %v1695_v26 = vpop.eup %1694 }
 0x427   :  { %1571 = vst.msk [vmem:[#allocation14 + $0x30] sm:$0xff] %vm697_vm1, %v996_v25  ;;  %v994_v9 = vmul.f32 %v1695_v26, %v1681_v0  ;;  %v969_v27 = vpop.xlane.xlu1 %968 }
 0x428   :  { %1696 = vrcp.f32 %v969_v27  ;;  %v981_v10 = vpop.xlane.xlu0 %980 }
 0x429   :  { %1569 = vst.msk [vmem:[#allocation14 + $0x20] sm:$0xff] %vm697_vm1, %v994_v9  ;;  %1698 = vrcp.f32 %v981_v10 }
 0x42e   :  { %v1697_v28 = vpop.eup %1696 }
 0x42f   :  { %v1699_v29 = vpop.eup %1698  ;;  %v993_v30 = vmul.f32 %v1697_v28, %v1683_v6 }
 0x430   :  { %v997_v31 = vmul.f32 %v1699_v29, %v1685_v7 }
 0x431   :  { %1568 = vst.msk [vmem:[#allocation14 + $0x18] sm:$0xff] %vm697_vm1, %v993_v30 }
 0x432   :  { %1572 = vst.msk [vmem:[#allocation14 + $0x38] sm:$0xff] %vm697_vm1, %v997_v31 }
 0x433   :  { %1598 = dma.vmem_to_hbm [thread:$0]  %s1591_s23, 1024, %s1593_s3, [#allocation15], %s1905_s17, %s1905_s17, %s1906_s18  }
 0x46c   :  { %v649_v32 = vpop.trf.xlu2 }
 0x46d   :  { %1629 = vmatpush.xpose.msk.msra.mxu1 %vm697_vm1, %v649_v32 }
 0x470   :  { %1630 = vmatmul.msk.f32.vlgmr.msra.gmra.mxu1 %vm697_vm1, %v2041_v46 }
 0x474   :  { %v650_v33 = vpop.trf.xlu2 }
 0x475   :  { %1631 = vmatpush.xpose.msk.msrb.mxu2 %vm697_vm1, %v650_v33 }
 0x478   :  { %1632 = vmatmul.msk.f32.vlgmr.msrb.gmra.mxu2 %vm697_vm1, %v991_v14 }
 0x47c   :  { %v651_v34 = vpop.trf.xlu2 }
 0x47d   :  { %1633 = vmatpush.xpose.msk.msra.mxu3 %vm697_vm1, %v651_v34 }
 0x480   :  { %1634 = vmatmul.msk.f32.vlgmr.msra.gmra.mxu3 %vm697_vm1, %v992_v15 }
 0x484   :  { %v652_v35 = vpop.trf.xlu2 }
 0x485   :  { %1635 = vmatpush.xpose.msk.msrb.mxu0 %vm697_vm1, %v652_v35 }
 0x488   :  { %1636 = vmatmul.msk.f32.vlgmr.msrb.gmra.mxu0 %vm697_vm1, %v993_v30 }
 0x492   :  { %v681_v36 = vpop.trf.xlu1 }
 0x493   :  { %1637 = vmatpush.xpose.msk.msrb.mxu1 %vm697_vm1, %v681_v36 }
 0x496   :  { %1638 = vmatmul.msk.f32.vlgmr.msrb.gmra.mxu1 %vm697_vm1, %v994_v9 }
 0x497   :  { %1552 = vmatpush.msra.mxu1 %v1529_v51 }
 0x499   :  { %1553 = vmatpush.msra.mxu1 %v1528_v52 }
 0x49a   :  { %v682_v37 = vpop.trf.xlu1 }
 0x49b   :  { %1639 = vmatpush.xpose.msk.msra.mxu2 %vm697_vm1, %v682_v37  ;;  %1554 = vmatpush.msra.mxu1 %v1527_v53 }
 0x49d   :  { %1555 = vmatpush.msra.mxu1 %v1526_v54 }
 0x49e   :  { %1640 = vmatmul.msk.f32.vlgmr.msra.gmra.mxu2 %vm697_vm1, %v995_v21 }
 0x4a2   :  { %v683_v38 = vpop.trf.xlu1 }
 0x4a3   :  { %1641 = vmatpush.xpose.msk.msrb.mxu3 %vm697_vm1, %v683_v38 }
 0x4a6   :  { %1642 = vmatmul.msk.f32.vlgmr.msrb.gmra.mxu3 %vm697_vm1, %v996_v25 }
 0x4aa   :  { %v684_v39 = vpop.trf.xlu1 }
 0x4ab   :  { %1643 = vmatpush.xpose.msk.msra.mxu0 %vm697_vm1, %v684_v39 }
 0x4ae   :  { %1644 = vmatmul.msk.f32.vlgmr.msra.gmra.mxu0 %vm697_vm1, %v997_v31 }
 0x4ed   :  { %v1021_v40 = vpop.f32.mrf.mxu1 }
 0x4ee   :  { %1206 = vxpose.xlu0.b32.start.end [1/1] (short) (narrow) %v1021_v40, 8 }
 0x4fb   :  { %v1047_v41 = vpop.f32.mrf.mxu2 }
 0x4fc   :  { %1238 = vxpose.xlu2.b32.start.end [1/1] (short) (narrow) %v1047_v41, 8 }
 0x503   :  { %v1073_v45 = vpop.f32.mrf.mxu3 }
 0x505   :  { %v1099_v43 = vpop.f32.mrf.mxu0 }
 0x513   :  { %v1125_v42 = vpop.f32.mrf.mxu1 }
 0x514   :  { %1334 = vxpose.xlu0.b32.start.end [1/1] (short) (narrow) %v1125_v42, 8 }
 0x51c   :  { %1302 = vxpose.xlu0.b32.start.end [1/1] (short) (narrow) %v1099_v43, 8 }
 0x521   :  { %v1151_v44 = vpop.f32.mrf.mxu2 }
 0x522   :  { %1366 = vxpose.xlu1.b32.start.end [1/1] (short) (narrow) %v1151_v44, 8 }
 0x524   :  { %1270 = vxpose.xlu0.b32.start.end [1/1] (short) (narrow) %v1073_v45, 8 }
 0x529   :  { %v1177_v46 = vpop.f32.mrf.mxu3 }
 0x52b   :  { %v1203_v47 = vpop.f32.mrf.mxu0 }
 0x52c   :  { %1398 = vxpose.xlu0.b32.start.end [1/1] (short) (narrow) %v1177_v46, 8  ;;  %1430 = vxpose.xlu2.b32.start.end [1/1] (short) (narrow) %v1203_v47, 8 }
 0x592   :  { %v1222_v48 = vpop.trf.xlu0 }
 0x593   :  { %1462 = vxpose.xlu0.b32.start [1/4] (short) (narrow) %v1222_v48, 8 }
 0x595   :  { %v1254_v49 = vpop.trf.xlu2 }
 0x59b   :  { %1463 = vxpose.xlu0.b32.cont [2/4] (short) (narrow) %v1254_v49, 8 }
 0x5b8   :  { %v1350_v50 = vpop.trf.xlu0 }
 0x5b9   :  { %1494 = vxpose.xlu2.b32.start [1/4] (short) (narrow) %v1350_v50, 8 }
 0x5c0   :  { %v1318_v55 = vpop.trf.xlu0 }
 0x5c5   :  { %v1446_v59 = vpop.trf.xlu2 }
 0x5c6   :  { %v1382_v56 = vpop.trf.xlu1 }
 0x5c7   :  { %1495 = vxpose.xlu2.b32.cont [2/4] (short) (narrow) %v1382_v56, 8 }
 0x5c8   :  { %v1286_v57 = vpop.trf.xlu0 }
 0x5c9   :  { %1464 = vxpose.xlu0.b32.cont [3/4] (short) (narrow) %v1286_v57, 8 }
 0x5d0   :  { %v1414_v58 = vpop.trf.xlu0 }
 0x5d1   :  { %1465 = vxpose.xlu0.b32.end [4/4] (short) (narrow) %v1318_v55, 8  ;;  %1496 = vxpose.xlu2.b32.cont [3/4] (short) (narrow) %v1414_v58, 8 }
 0x5d9   :  { %1497 = vxpose.xlu2.b32.end [4/4] (short) (narrow) %v1446_v59, 8 }
 0x65a   :  { %v1510_v61 = vpop.trf.xlu2 }
 0x65d   :  { %v1478_v60 = vpop.trf.xlu0 }
 0x65e   :  { %1645 = vmatmul.msk.f32.vlgmr.msra.gmra.mxu1 %vm141_vm0, %v1478_v60 }
 0x666   :  { %1646 = vmatmul.msk.f32.gmra.mxu1 %vm141_vm0, %v1510_v61 }
 0x6db   :  { %v1557_v63 = vpop.f32.mrf.mxu1 }
 0x6dc   :  { %v1558_v0 = vadd.f32 %v1667_v62, %v1557_v63 }
 0x6de   :  { %1563 = vst.msk [vmem:[#allocation13] sm:$0xff] %vm141_vm0, %v1558_v0 }
 0x6e3   :  { %v1560_v1 = vpop.f32.mrf.mxu1 }
 0x6e4   :  { %v1561_v2 = vadd.f32 %v1667_v62, %v1560_v1 }
 0x6e6   :  { %1564 = vst.msk [vmem:[#allocation13 + $0x8] sm:$0xff] %vm141_vm0, %v1561_v2 }
 0x6e7   :  { %1585 = dma.vmem_to_hbm [thread:$0]  %s1578_s29, 256, %s1580_s9, [#allocation4], %s1905_s17, %s1905_s17, %s1906_s18  }
 0x6e8   :  { %1900 = dma.done.wait [#allocation4], 256  }
 0x6e9   :  { %1901 = vsyncadd [#allocation4], 4294967040 }
 0x6ea   :  { %1902 = dma.done.wait [#allocation15], 1024  }
 0x6eb   :  { %1903 = vsyncadd [#allocation15], 4294966272 }
 0x6ec   :  { %1607 = vsyncpa [#allocation3], 1 }
 0x6ed   :  { %1608 = vsyncpa [#allocation6], 1 }
 0x6ee   :  { %1609 = vsyncpa [#allocation9], 1 }
 0x6ef   :  { %1610 = vsyncpa [#allocation12], 1 }
 0x6f0   :  { %1611 = vsyncpa [#allocation4], 1 }
 0x6f1   :  { %1612 = vsyncpa [#allocation15], 1 }

</bundles_post_ra>
